<compile_context>
chip_gen: v7x
topology: tpu7x:2x2x1
jax: 0.10.0
libtpu: 0.0.40
codegen_flags: <defaults>
</compile_context>

<pallas_src>
import functools

import jax
import jax.numpy as jnp
from jax.experimental import pallas as pl
from jax.experimental.pallas import tpu as pltpu

BN_EPS = 1e-5
LANE = 128


def _make_decoder_kernel(n_hidden, group_batch):
    """Fused kernel: n_hidden x (Linear + BN(train) + ReLU) then Linear + Sigmoid.

    Refs: x_ref (GB, F) f32, w_ref (n_hidden+1, F, F) bf16,
          v_ref (2*n_hidden+1, F) f32 [gamma_0, beta_0, ..., final_bias], out_ref (GB, F) f32.
    All feature dims are zero-padded to F = 128; padded lanes stay exactly 0 through
    every hidden layer (zero gamma/beta on padded lanes -> scale = shift = 0).
    """
    inv_b = 1.0 / float(group_batch)

    def kernel(x_ref, w_ref, v_ref, out_ref):
        vecs = v_ref[...]                      # tiny (2H+1, 128) f32, load once
        h = x_ref[...]                         # (GB, 128) f32

        for i in range(n_hidden):
            # Linear: bf16 x bf16 straight to the MXU, f32 accumulate.
            # (hidden bias omitted -- cancels exactly through train-mode BN)
            h = jnp.dot(h.astype(jnp.bfloat16), w_ref[i],
                        preferred_element_type=jnp.float32)

            # One-pass batch stats off the same h read (cheap XLU sublane reduces).
            s = jnp.sum(h, axis=0, keepdims=True)
            sq = jnp.sum(h * h, axis=0, keepdims=True)
            mean = s * inv_b
            var = jnp.maximum(sq * inv_b - mean * mean, 0.0)   # biased var, clamp >= 0

            gamma = vecs[2 * i:2 * i + 1, :]
            beta = vecs[2 * i + 1:2 * i + 2, :]
            scale = jax.lax.rsqrt(var + BN_EPS) * gamma        # (1, 128)
            shift = beta - mean * scale                        # (1, 128)

            # BN + ReLU: one broadcast mul + add + max per element (f32 on the VPU).
            h = jnp.maximum(h * scale + shift, 0.0)

        # Final Linear (+ bias) + Sigmoid (EUP).
        bias = vecs[2 * n_hidden:2 * n_hidden + 1, :]
        h = jnp.dot(h.astype(jnp.bfloat16), w_ref[n_hidden],
                    preferred_element_type=jnp.float32) + bias
        out_ref[...] = jax.nn.sigmoid(h)

    return kernel


def init_decoder_fc_params(key, latent_size, hidden_sizes, output_size):
    """Deterministic parameter init (shapes match the PyTorch module).

    Weights stored bfloat16 (native MXU dtype, half the DMA bytes);
    biases / gamma / beta stay float32.
    """
    params = []
    prev = latent_size
    for hs in hidden_sizes:
        key, kw, kb, kg, kbe = jax.random.split(key, 5)
        bound = 1.0 / jnp.sqrt(prev)
        w = jax.random.uniform(kw, (prev, hs), jnp.float32, -bound, bound)
        b = jax.random.uniform(kb, (1, hs), jnp.float32, -bound, bound)
        gamma = 1.0 + 0.1 * jax.random.normal(kg, (1, hs), jnp.float32)
        beta = 0.1 * jax.random.normal(kbe, (1, hs), jnp.float32)
        params += [w.astype(jnp.bfloat16), b, gamma, beta]
        prev = hs
    key, kw, kb = jax.random.split(key, 3)
    bound = 1.0 / jnp.sqrt(prev)
    w = jax.random.uniform(kw, (prev, output_size), jnp.float32, -bound, bound)
    b = jax.random.uniform(kb, (1, output_size), jnp.float32, -bound, bound)
    params += [w.astype(jnp.bfloat16), b]
    return params


def decoder_fc_forward(x, params, hidden_sizes, output_size, latent_size,
                       group_batch=None):
    """Fused, gridded Pallas forward.

    x: (num_groups * group_batch, latent_size) f32.  Each group of `group_batch`
    rows is one independent DecoderFC forward pass (train-mode BN over that group).
    With group_batch == x.shape[0] this is exactly the PyTorch module's forward.
    """
    total_b = x.shape[0]
    n_hidden = len(hidden_sizes)
    n_layers = n_hidden + 1
    if group_batch is None:
        group_batch = total_b
    assert total_b % group_batch == 0
    assert group_batch % 8 == 0, "group_batch must be a multiple of 8 sublanes"
    num_groups = total_b // group_batch

    max_dim = max([latent_size, output_size] + list(hidden_sizes))
    f_pad = LANE * ((max_dim + LANE - 1) // LANE)      # lane-dense width (128 here)

    # --- pack: one bf16 weight slab + one f32 vector slab -------------------
    w_rows, v_rows = [], []
    idx = 0
    prev = latent_size
    for hs in hidden_sizes:
        w, _b_unused, g, beta = params[idx:idx + 4]    # hidden bias dropped (BN-cancelled)
        idx += 4
        w_rows.append(jnp.pad(w, ((0, f_pad - prev), (0, f_pad - hs))))
        v_rows.append(jnp.pad(g, ((0, 0), (0, f_pad - hs))))
        v_rows.append(jnp.pad(beta, ((0, 0), (0, f_pad - hs))))
        prev = hs
    w, b = params[idx:idx + 2]
    w_rows.append(jnp.pad(w, ((0, f_pad - prev), (0, f_pad - output_size))))
    v_rows.append(jnp.pad(b, ((0, 0), (0, f_pad - output_size))))
    w_slab = jnp.stack(w_rows, axis=0).astype(jnp.bfloat16)   # (n_layers, 128, 128)
    v_slab = jnp.concatenate(v_rows, axis=0)                  # (2H+1, 128) f32

    x_pad = jnp.pad(x, ((0, 0), (0, f_pad - latent_size)))    # (total_b, 128) f32

    kernel = _make_decoder_kernel(n_hidden, group_batch)

    out = pl.pallas_call(
        kernel,
        out_shape=jax.ShapeDtypeStruct((total_b, f_pad), jnp.float32),
        grid=(num_groups,),
        in_specs=[
            pl.BlockSpec((group_batch, f_pad), lambda g: (g, 0)),
            pl.BlockSpec((n_layers, f_pad, f_pad), lambda g: (0, 0, 0)),   # resident
            pl.BlockSpec((2 * n_hidden + 1, f_pad), lambda g: (0, 0)),     # resident
        ],
        out_specs=pl.BlockSpec((group_batch, f_pad), lambda g: (g, 0)),
        compiler_params=pltpu.CompilerParams(
            dimension_semantics=("parallel",)),     # shards groups across v7x's 2 TCs
    )(x_pad, w_slab, v_slab)

    # out.view(batch_size, -1) on a (B, output_size) tensor is the identity.
    return out[:, :output_size].reshape(total_b, -1)


def decoder_fc_reference(x, params, hidden_sizes):
    """Pure-JAX reference matching PyTorch forward exactly (train-mode BatchNorm,
    hidden biases included, two-pass variance, f32 math on bf16-stored weights)."""
    h = x.astype(jnp.float32)
    idx = 0
    for _ in hidden_sizes:
        w, b, g, beta = params[idx:idx + 4]
        idx += 4
        h = h @ w.astype(jnp.float32) + b
        mean = jnp.mean(h, axis=0, keepdims=True)
        var = jnp.mean((h - mean) ** 2, axis=0, keepdims=True)
        h = (h - mean) * jax.lax.rsqrt(var + BN_EPS) * g + beta
        h = jnp.maximum(h, 0.0)
    w, b = params[idx:idx + 2]
    return jax.nn.sigmoid(h @ w.astype(jnp.float32) + b)


if __name__ == "__main__":
    latent_size = 32
    hidden_sizes = (64, 32)
    output_size = 128
    batch = 8

    key = jax.random.PRNGKey(0)
    key, kx, kx2 = jax.random.split(key, 3)
    x = jax.random.normal(kx, (batch, latent_size), jnp.float32)

    params = init_decoder_fc_params(key, latent_size, hidden_sizes, output_size)

    # --- single-group call: exactly the PyTorch module's forward ------------
    fwd = jax.jit(functools.partial(decoder_fc_forward,
                                    hidden_sizes=hidden_sizes,
                                    output_size=output_size,
                                    latent_size=latent_size,
                                    group_batch=batch))
    out = jax.block_until_ready(fwd(x, params))
    ref = decoder_fc_reference(x, params, hidden_sizes)
    assert out.shape == (batch, output_size)
    # Tolerance covers bf16 rounding of activations at the MXU input plus the
    # (mathematically exact) algebraic refactors: BN-cancelled hidden biases and
    # one-pass variance.  Sigmoid outputs live in [0, 1].
    assert jnp.allclose(out, ref, atol=5e-3, rtol=5e-3), "single-group mismatch"

    # --- multi-group call: 4 independent 8-row batches through one launch ---
    num_groups = 4
    xs = jax.random.normal(kx2, (num_groups * batch, latent_size), jnp.float32)
    out_multi = jax.block_until_ready(fwd(xs, params))
    ref_multi = jnp.concatenate(
        [decoder_fc_reference(xs[g * batch:(g + 1) * batch], params, hidden_sizes)
         for g in range(num_groups)], axis=0)
    assert out_multi.shape == (num_groups * batch, output_size)
    assert jnp.allclose(out_multi, ref_multi, atol=5e-3, rtol=5e-3), "multi-group mismatch"

    print("KERNEL_OK")
</pallas_src>

<mosaic_0001>
module attributes {stable_mosaic.version = 11 : i64} {
  func.func @kernel(%arg0: i32, %arg1: memref<8x128xf32, #tpu.memory_space<vmem>>, %arg2: memref<3x128x128xbf16, #tpu.memory_space<vmem>>, %arg3: memref<5x128xf32, #tpu.memory_space<vmem>>, %arg4: memref<8x128xf32, #tpu.memory_space<vmem>>) attributes {dimension_semantics = [#tpu.dimension_semantics<parallel>], iteration_bounds = array<i64: 1>, scalar_prefetch = 0 : i64, scratch_operands = 0 : i64, tpu.core_type = #tpu.core_type<tc>, window_params = [{transform_indices = @transform_0, window_bounds = array<i64: 8, 128>}, {pipeline_mode = #tpu.pipeline_mode<synchronous>, transform_indices = @transform_1, window_bounds = array<i64: 3, 128, 128>}, {pipeline_mode = #tpu.pipeline_mode<synchronous>, transform_indices = @transform_2, window_bounds = array<i64: 5, 128>}, {transform_indices = @transform_3, window_bounds = array<i64: 8, 128>}]} {
    %c0 = arith.constant 0 : index
    %c0_0 = arith.constant 0 : index
    %0 = vector.load %arg3[%c0, %c0_0] : memref<5x128xf32, #tpu.memory_space<vmem>>, vector<5x128xf32>
    %c0_1 = arith.constant 0 : index
    %c0_2 = arith.constant 0 : index
    %1 = vector.load %arg1[%c0_1, %c0_2] : memref<8x128xf32, #tpu.memory_space<vmem>>, vector<8x128xf32>
    %2 = arith.truncf %1 : vector<8x128xf32> to vector<8x128xbf16>
    %c0_3 = arith.constant 0 : index
    %c0_4 = arith.constant 0 : index
    %c0_5 = arith.constant 0 : index
    %3 = vector.load %arg2[%c0_3, %c0_4, %c0_5] : memref<3x128x128xbf16, #tpu.memory_space<vmem>>, vector<1x128x128xbf16>
    %4 = vector.shape_cast %3 : vector<1x128x128xbf16> to vector<128x128xbf16>
    %cst = arith.constant dense<0.000000e+00> : vector<8x128xf32>
    %5 = tpu.matmul %2, %4, %cst {dimension_numbers = #tpu.dot_dimension_numbers<[1], [0], [0], [1], [0, 0, 1, 1], [], []>} : vector<8x128xbf16>, vector<128x128xbf16>, vector<8x128xf32> -> vector<8x128xf32>
    %cst_6 = arith.constant dense<0.000000e+00> : vector<128xf32>
    %6 = vector.multi_reduction <add>, %5, %cst_6 [0] : vector<8x128xf32> to vector<128xf32>
    %7 = vector.shape_cast %6 : vector<128xf32> to vector<1x128xf32>
    %8 = arith.mulf %5, %5 : vector<8x128xf32>
    %cst_7 = arith.constant dense<0.000000e+00> : vector<128xf32>
    %9 = vector.multi_reduction <add>, %8, %cst_7 [0] : vector<8x128xf32> to vector<128xf32>
    %10 = vector.shape_cast %9 : vector<128xf32> to vector<1x128xf32>
    %cst_8 = arith.constant 1.250000e-01 : f32
    %11 = vector.broadcast %cst_8 : f32 to vector<1x128xf32>
    %12 = arith.mulf %7, %11 : vector<1x128xf32>
    %cst_9 = arith.constant 1.250000e-01 : f32
    %13 = vector.broadcast %cst_9 : f32 to vector<1x128xf32>
    %14 = arith.mulf %10, %13 : vector<1x128xf32>
    %15 = arith.mulf %12, %12 : vector<1x128xf32>
    %16 = arith.subf %14, %15 : vector<1x128xf32>
    %cst_10 = arith.constant 0.000000e+00 : f32
    %17 = vector.broadcast %cst_10 : f32 to vector<1x128xf32>
    %18 = arith.maximumf %16, %17 : vector<1x128xf32>
    %19 = vector.extract_strided_slice %0 {offsets = [0, 0], sizes = [1, 128], strides = [1, 1]} : vector<5x128xf32> to vector<1x128xf32>
    %20 = vector.extract_strided_slice %0 {offsets = [1, 0], sizes = [1, 128], strides = [1, 1]} : vector<5x128xf32> to vector<1x128xf32>
    %cst_11 = arith.constant 9.99999974E-6 : f32
    %21 = vector.broadcast %cst_11 : f32 to vector<1x128xf32>
    %22 = arith.addf %18, %21 : vector<1x128xf32>
    %23 = math.rsqrt %22 : vector<1x128xf32>
    %24 = arith.mulf %23, %19 : vector<1x128xf32>
    %25 = arith.mulf %12, %24 : vector<1x128xf32>
    %26 = arith.subf %20, %25 : vector<1x128xf32>
    %27 = vector.broadcast %24 : vector<1x128xf32> to vector<8x128xf32>
    %28 = arith.mulf %5, %27 : vector<8x128xf32>
    %29 = vector.broadcast %26 : vector<1x128xf32> to vector<8x128xf32>
    %30 = arith.addf %28, %29 : vector<8x128xf32>
    %cst_12 = arith.constant 0.000000e+00 : f32
    %31 = vector.broadcast %cst_12 : f32 to vector<8x128xf32>
    %32 = arith.maximumf %30, %31 : vector<8x128xf32>
    %33 = arith.truncf %32 : vector<8x128xf32> to vector<8x128xbf16>
    %c1 = arith.constant 1 : index
    %c0_13 = arith.constant 0 : index
    %c0_14 = arith.constant 0 : index
    %34 = vector.load %arg2[%c1, %c0_13, %c0_14] : memref<3x128x128xbf16, #tpu.memory_space<vmem>>, vector<1x128x128xbf16>
    %35 = vector.shape_cast %34 : vector<1x128x128xbf16> to vector<128x128xbf16>
    %cst_15 = arith.constant dense<0.000000e+00> : vector<8x128xf32>
    %36 = tpu.matmul %33, %35, %cst_15 {dimension_numbers = #tpu.dot_dimension_numbers<[1], [0], [0], [1], [0, 0, 1, 1], [], []>} : vector<8x128xbf16>, vector<128x128xbf16>, vector<8x128xf32> -> vector<8x128xf32>
    %cst_16 = arith.constant dense<0.000000e+00> : vector<128xf32>
    %37 = vector.multi_reduction <add>, %36, %cst_16 [0] : vector<8x128xf32> to vector<128xf32>
    %38 = vector.shape_cast %37 : vector<128xf32> to vector<1x128xf32>
    %39 = arith.mulf %36, %36 : vector<8x128xf32>
    %cst_17 = arith.constant dense<0.000000e+00> : vector<128xf32>
    %40 = vector.multi_reduction <add>, %39, %cst_17 [0] : vector<8x128xf32> to vector<128xf32>
    %41 = vector.shape_cast %40 : vector<128xf32> to vector<1x128xf32>
    %cst_18 = arith.constant 1.250000e-01 : f32
    %42 = vector.broadcast %cst_18 : f32 to vector<1x128xf32>
    %43 = arith.mulf %38, %42 : vector<1x128xf32>
    %cst_19 = arith.constant 1.250000e-01 : f32
    %44 = vector.broadcast %cst_19 : f32 to vector<1x128xf32>
    %45 = arith.mulf %41, %44 : vector<1x128xf32>
    %46 = arith.mulf %43, %43 : vector<1x128xf32>
    %47 = arith.subf %45, %46 : vector<1x128xf32>
    %cst_20 = arith.constant 0.000000e+00 : f32
    %48 = vector.broadcast %cst_20 : f32 to vector<1x128xf32>
    %49 = arith.maximumf %47, %48 : vector<1x128xf32>
    %50 = vector.extract_strided_slice %0 {offsets = [2, 0], sizes = [1, 128], strides = [1, 1]} : vector<5x128xf32> to vector<1x128xf32>
    %51 = vector.extract_strided_slice %0 {offsets = [3, 0], sizes = [1, 128], strides = [1, 1]} : vector<5x128xf32> to vector<1x128xf32>
    %cst_21 = arith.constant 9.99999974E-6 : f32
    %52 = vector.broadcast %cst_21 : f32 to vector<1x128xf32>
    %53 = arith.addf %49, %52 : vector<1x128xf32>
    %54 = math.rsqrt %53 : vector<1x128xf32>
    %55 = arith.mulf %54, %50 : vector<1x128xf32>
    %56 = arith.mulf %43, %55 : vector<1x128xf32>
    %57 = arith.subf %51, %56 : vector<1x128xf32>
    %58 = vector.broadcast %55 : vector<1x128xf32> to vector<8x128xf32>
    %59 = arith.mulf %36, %58 : vector<8x128xf32>
    %60 = vector.broadcast %57 : vector<1x128xf32> to vector<8x128xf32>
    %61 = arith.addf %59, %60 : vector<8x128xf32>
    %cst_22 = arith.constant 0.000000e+00 : f32
    %62 = vector.broadcast %cst_22 : f32 to vector<8x128xf32>
    %63 = arith.maximumf %61, %62 : vector<8x128xf32>
    %64 = vector.extract_strided_slice %0 {offsets = [4, 0], sizes = [1, 128], strides = [1, 1]} : vector<5x128xf32> to vector<1x128xf32>
    %65 = arith.truncf %63 : vector<8x128xf32> to vector<8x128xbf16>
    %c2 = arith.constant 2 : index
    %c0_23 = arith.constant 0 : index
    %c0_24 = arith.constant 0 : index
    %66 = vector.load %arg2[%c2, %c0_23, %c0_24] : memref<3x128x128xbf16, #tpu.memory_space<vmem>>, vector<1x128x128xbf16>
    %67 = vector.shape_cast %66 : vector<1x128x128xbf16> to vector<128x128xbf16>
    %cst_25 = arith.constant dense<0.000000e+00> : vector<8x128xf32>
    %68 = tpu.matmul %65, %67, %cst_25 {dimension_numbers = #tpu.dot_dimension_numbers<[1], [0], [0], [1], [0, 0, 1, 1], [], []>} : vector<8x128xbf16>, vector<128x128xbf16>, vector<8x128xf32> -> vector<8x128xf32>
    %69 = vector.broadcast %64 : vector<1x128xf32> to vector<8x128xf32>
    %70 = arith.addf %68, %69 : vector<8x128xf32>
    %71 = arith.negf %70 : vector<8x128xf32>
    %72 = math.exp %71 : vector<8x128xf32>
    %cst_26 = arith.constant 1.000000e+00 : f32
    %73 = vector.broadcast %cst_26 : f32 to vector<8x128xf32>
    %74 = arith.addf %73, %72 : vector<8x128xf32>
    %75 = arith.divf %73, %74 : vector<8x128xf32>
    %c0_27 = arith.constant 0 : index
    %c0_28 = arith.constant 0 : index
    %76 = vector.load %arg4[%c0_27, %c0_28] : memref<8x128xf32, #tpu.memory_space<vmem>>, vector<8x128xf32>
    tpu.vector_store %arg4[%c0_27, %c0_28], %75 {strides = array<i32>} : memref<8x128xf32, #tpu.memory_space<vmem>>, vector<8x128xf32>,
    return
  }
  func.func @transform_0(%arg0: i32) -> (i32, i32) {
    %c0_i32 = arith.constant 0 : i32
    %c0_i32_0 = arith.constant 0 : i32
    return %arg0, %c0_i32 : i32, i32
  }
  func.func @transform_1(%arg0: i32) -> (i32, i32, i32) {
    %c0_i32 = arith.constant 0 : i32
    %c0_i32_0 = arith.constant 0 : i32
    %c0_i32_1 = arith.constant 0 : i32
    %c0_i32_2 = arith.constant 0 : i32
    return %c0_i32, %c0_i32_0, %c0_i32_1 : i32, i32, i32
  }
  func.func @transform_2(%arg0: i32) -> (i32, i32) {
    %c0_i32 = arith.constant 0 : i32
    %c0_i32_0 = arith.constant 0 : i32
    %c0_i32_1 = arith.constant 0 : i32
    return %c0_i32, %c0_i32_0 : i32, i32
  }
  func.func @transform_3(%arg0: i32) -> (i32, i32) {
    %c0_i32 = arith.constant 0 : i32
    %c0_i32_0 = arith.constant 0 : i32
    return %arg0, %c0_i32 : i32, i32
  }
}

</mosaic_0001>

<bundles_post_ra>
// kernel: decoder_fc_forward.1
= control target key start
LH: loop header
LB: loop body
LE: loop exit
PB: predicated region body
PF: predicated region fallthrough
CT: control target
= control target key end

     0   :  { %v637_v1 = vmov 0.0   ;;  %vm638_vm0 = vmmov 0   ;;  %s794_s0 = inlined_call_operand.vmem [shape: f32[8,128], index: 0, kind: input, shape index: {}]   ;;  %s795_s1 = inlined_call_operand.vmem [shape: bf16[3,128,128], index: 1, kind: input, shape index: {}]   ;;  %s796_s2 = inlined_call_operand.vmem [shape: f32[5,128], index: 2, kind: input, shape index: {}]   ;;  %s797_s3 = inlined_call_operand.hbm [shape: f32[8,128], index: 3, kind: output, shape index: {}]  }
   0x1   :  { %v581_v0 = vld [vmem:[%s795_s1] sm:$0xff]   ;;  %518 = vmatprep.subr.bf16.mxu0 %v637_v1  ;;  %538 = vmatprep.subr.bf16.mxu1 %v637_v1  ;;  %v582_v2 = vld [vmem:[%s795_s1 + $0x8] sm:$0xff]   ;;  %v583_v3 = vld [vmem:[%s795_s1 + $0x10] sm:$0xff]  }
   0x2   :  { %519 = vmatpush3.bf16.msra.mxu0 %v581_v0  ;;  %534 = vmatprep.mubr.msk.bf16.mxu0 %vm638_vm0, %v637_v1  ;;  %v584_v4 = vld [vmem:[%s795_s1 + $0x18] sm:$0xff]   ;;  %v585_v5 = vld [vmem:[%s795_s1 + $0x20] sm:$0xff]   ;;  %v586_v6 = vld [vmem:[%s795_s1 + $0x28] sm:$0xff]  }
   0x3   :  { %520 = vmatprep.subr.bf16.mxu0 %v637_v1  ;;  %554 = vmatprep.mubr.msk.bf16.mxu1 %vm638_vm0, %v637_v1 }
   0x6   :  { %521 = vmatpush3.bf16.msra.mxu0 %v582_v2 }
   0x7   :  { %522 = vmatprep.subr.bf16.mxu0 %v637_v1 }
   0xa   :  { %523 = vmatpush3.bf16.msra.mxu0 %v583_v3 }
   0xb   :  { %524 = vmatprep.subr.bf16.mxu0 %v637_v1 }
   0xe   :  { %525 = vmatpush3.bf16.msra.mxu0 %v584_v4 }
   0xf   :  { %526 = vmatprep.subr.bf16.mxu0 %v637_v1 }
  0x12   :  { %527 = vmatpush3.bf16.msra.mxu0 %v585_v5 }
  0x13   :  { %528 = vmatprep.subr.bf16.mxu0 %v637_v1 }
  0x14   :  { %8 = vsyncpa [#allocation3], 0  ;;  %v587_v7 = vld [vmem:[%s795_s1 + $0x30] sm:$0xff]   ;;  %v588_v8 = vld [vmem:[%s795_s1 + $0x38] sm:$0xff]   ;;  %v149_v42 = vlaneseq }
  0x15   :  { %v17_v9 = vld [vmem:[%s794_s0] sm:$0xff]  ;;  %v590_v12 = vld [vmem:[%s795_s1 + $0x48] sm:$0xff]   ;;  %v591_v13 = vld [vmem:[%s795_s1 + $0x50] sm:$0xff]  }
  0x16   :  { %529 = vmatpush3.bf16.msra.mxu0 %v586_v6  ;;  %v18_v10 = vpack.c.bf16 %v17_v9, %v17_v9  ;;  %v589_v11 = vld [vmem:[%s795_s1 + $0x40] sm:$0xff]   ;;  %v592_v14 = vld [vmem:[%s795_s1 + $0x58] sm:$0xff]   ;;  %v594_v16 = vld [vmem:[%s795_s1 + $0x68] sm:$0xff]   ;;  %v734_v43 = vshrl.u32 %v149_v42, 7 }
  0x17   :  { %530 = vmatprep.subr.bf16.mxu0 %v637_v1  ;;  %539 = vmatpush3.bf16.msra.mxu1 %v589_v11  ;;  %v593_v15 = vld [vmem:[%s795_s1 + $0x60] sm:$0xff]   ;;  %v595_v17 = vld [vmem:[%s795_s1 + $0x70] sm:$0xff]   ;;  %v596_v18 = vld [vmem:[%s795_s1 + $0x78] sm:$0xff]  }
  0x18   :  { %540 = vmatprep.subr.bf16.mxu1 %v637_v1  ;;  %v739_v44 = vld [vmem:[%s796_s2] sm:$0x1f]  ;;  %v151_v47 = vsub.s32 0, %v734_v43  ;;  %v156_v51 = vsub.s32 1, %v734_v43  ;;  %v598_v59 = vld [vmem:[%s795_s1 + $0x88] sm:$0xff]   ;;  %v599_v60 = vld [vmem:[%s795_s1 + $0x90] sm:$0xff]  }
  0x19   :  { %v597_v58 = vld [vmem:[%s795_s1 + $0x80] sm:$0xff]   ;;  %v600_v61 = vld [vmem:[%s795_s1 + $0x98] sm:$0xff]   ;;  %v602_v63 = vld [vmem:[%s795_s1 + $0xa8] sm:$0xff]  }
  0x1a   :  { %531 = vmatpush3.bf16.msra.mxu0 %v587_v7  ;;  %v601_v62 = vld [vmem:[%s795_s1 + $0xa0] sm:$0xff]   ;;  %v603_v0 = vld [vmem:[%s795_s1 + $0xb0] sm:$0xff]   ;;  %v604_v2 = vld [vmem:[%s795_s1 + $0xb8] sm:$0xff]   ;;  %s639_s1 = smov [#allocation2]  }
  0x1b   :  { %532 = vmatprep.subr.bf16.mxu0 %v637_v1  ;;  %541 = vmatpush3.bf16.msra.mxu1 %v590_v12  ;;  %s426_s7 = sshll.u32 %s639_s1, 4  ;;  %s427_s7 = int_to_ptr.vmem [resolvable:$true] %s426_s7 }
  0x1c   :  { %542 = vmatprep.subr.bf16.mxu1 %v637_v1  ;;  %s613_s8 = scalar_lea.vmem %s427_s7, 128  ;;  %p618_p1 = scmp.lt.s32.totalorder %s427_s7, %s427_s7 }
  0x1d   :  { %p614_p0 = scmp.ne.s32.totalorder %s427_s7, %s613_s8  ;;  %p619_p2 = scmp.lt.s32.totalorder %s613_s8, %s613_s8 }
  0x1e   :  { %533 = vmatpush3.bf16.msra.mxu0 %v588_v8 }
  0x1f   :  { %558 = vmatprep.subr.bf16.mxu0 %v637_v1  ;;  %543 = vmatpush3.bf16.msra.mxu1 %v591_v13  ;;  %p620_p3 = por %p619_p2, %p618_p1 }
  0x20   :  { %544 = vmatprep.subr.bf16.mxu1 %v637_v1 }
  0x21   :  { %535 = vmatmul.mubr.bf16.vlgmr.msra.gmra.mrb[0].mxu0 %v18_v10  ;;  %p621_p4 = pnand %p620_p3, %p614_p0 }
  0x22   :  { %574 = vmatprep.mubr.msk.bf16.mxu0 %vm638_vm0, %v637_v1  ;;  %559 = vmatpush3.bf16.msra.mxu0 %v597_v58 }
  0x23   :  { %545 = vmatpush3.bf16.msra.mxu1 %v592_v14  ;;  %560 = vmatprep.subr.bf16.mxu0 %v637_v1 }
  0x24   :  { %546 = vmatprep.subr.bf16.mxu1 %v637_v1 }
  0x26   :  { %561 = vmatpush3.bf16.msra.mxu0 %v598_v59 }
  0x27   :  { %547 = vmatpush3.bf16.msra.mxu1 %v593_v15  ;;  %562 = vmatprep.subr.bf16.mxu0 %v637_v1 }
  0x28   :  { %548 = vmatprep.subr.bf16.mxu1 %v637_v1 }
  0x2a   :  { %563 = vmatpush3.bf16.msra.mxu0 %v599_v60 }
  0x2b   :  { %549 = vmatpush3.bf16.msra.mxu1 %v594_v16  ;;  %564 = vmatprep.subr.bf16.mxu0 %v637_v1 }
  0x2c   :  { %550 = vmatprep.subr.bf16.mxu1 %v637_v1 }
  0x2e   :  { %565 = vmatpush3.bf16.msra.mxu0 %v600_v61 }
  0x2f   :  { %551 = vmatpush3.bf16.msra.mxu1 %v595_v17  ;;  %566 = vmatprep.subr.bf16.mxu0 %v637_v1 }
  0x30   :  { %552 = vmatprep.subr.bf16.mxu1 %v637_v1 }
  0x32   :  { %567 = vmatpush3.bf16.msra.mxu0 %v601_v62 }
  0x33   :  { %553 = vmatpush3.bf16.msra.mxu1 %v596_v18  ;;  %568 = vmatprep.subr.bf16.mxu0 %v637_v1 }
  0x36   :  { %569 = vmatpush3.bf16.msra.mxu0 %v602_v63 }
  0x37   :  { %570 = vmatprep.subr.bf16.mxu0 %v637_v1 }
  0x3a   :  { %571 = vmatpush3.bf16.msra.mxu0 %v603_v0 }
  0x3b   :  { %572 = vmatprep.subr.bf16.mxu0 %v637_v1 }
  0x3e   :  { %573 = vmatpush3.bf16.msra.mxu0 %v604_v2 }
  0xf4   :  { %v117_v19 = vpop.f32.mrb[0].mxu0 }
  0xf5   :  { %v123_v20 = vrot.slane %v117_v19, 4  ;;  %v129_v21 = vmul.f32 %v117_v19, %v117_v19  ;;  %v536_v22 = vpop.f32.mrb[1].mxu0 }
  0xf6   :  { %v120_v23 = vpop.f32.mrb[2].mxu0 }
  0xf7   :  { %v124_v24 = vadd.f32 %v123_v20, %v117_v19  ;;  %v130_v25 = vrot.slane %v129_v21, 4  ;;  %v537_v26 = vpop.f32.mrb[3].mxu0 }
  0xf9   :  { %v125_v27 = vrot.slane %v124_v24, 2  ;;  %v131_v28 = vadd.f32 %v130_v25, %v129_v21 }
  0xfb   :  { %v126_v29 = vadd.f32 %v125_v27, %v124_v24  ;;  %v132_v30 = vrot.slane %v131_v28, 2  ;;  %v294_v27 = vsub.s32 2, %v734_v43 }
  0xfd   :  { %v127_v31 = vrot.slane %v126_v29, 1  ;;  %v133_v32 = vadd.f32 %v132_v30, %v131_v28 }
  0xff   :  { %v128_v33 = vadd.f32 %v127_v31, %v126_v29  ;;  %v134_v34 = vrot.slane %v133_v32, 1  ;;  %v299_v31 = vsub.s32 3, %v734_v43 }
 0x101   :  { %v135_v35 = vadd.f32 %v134_v34, %v133_v32  ;;  %v136_v36 = vmul.f32 0.125, %v128_v33 }
 0x103   :  { %v137_v37 = vmul.f32 0.125, %v135_v35  ;;  %v138_v38 = vmul.f32 %v136_v36, %v136_v36 }
 0x105   :  { %v139_v39 = vsub.f32 %v137_v37, %v138_v38  ;;  %v323_v38 = vsub.s32 4, %v734_v43 }
 0x107   :  { %v140_v40 = vmax.f32 %v139_v39, 0.0  ;;  %v324_v39 = vrot.slane %v739_v44, %v323_v38 }
 0x109   :  { %v141_v41 = vadd.f32 1e-05, %v140_v40 }
 0x10b   :  { %605 = vrsqrt.f32 %v141_v41 }
 0x115   :  { %v606_v45 = vpop.eup %605 }
 0x116   :  { %v143_v46 = vmul.f32 %v606_v45, %v739_v44 }
 0x118   :  { %v144_v48 = vmul.f32 %v143_v46, %v136_v36  ;;  %v152_v49 = vrot.slane %v143_v46, %v151_v47 }
 0x11a   :  { %v146_v50 = vrot.slane %v144_v48, 7  ;;  %v153_v53 = vmul.f32 %v152_v49, %v117_v19 }
 0x11c   :  { %v148_v52 = vsub.f32 %v739_v44, %v146_v50 }
 0x11e   :  { %v157_v54 = vrot.slane %v148_v52, %v156_v51 }
 0x120   :  { %v158_v55 = vadd.f32 %v157_v54, %v153_v53 }
 0x122   :  { %v159_v56 = vmax.f32 %v158_v55, 0.0 }
 0x124   :  { %v160_v57 = vpack.c.bf16 %v159_v56, %v159_v56 }
 0x126   :  { %555 = vmatmul.mubr.bf16.vlgmr.msra.gmra.mrb[0].mxu1 %v160_v57 }
 0x1f9   :  { %v260_v3 = vpop.f32.mrb[0].mxu1 }
 0x1fa   :  { %v266_v4 = vrot.slane %v260_v3, 4  ;;  %v272_v5 = vmul.f32 %v260_v3, %v260_v3  ;;  %v556_v6 = vpop.f32.mrb[1].mxu1 }
 0x1fb   :  { %v263_v7 = vpop.f32.mrb[2].mxu1 }
 0x1fc   :  { %v267_v8 = vadd.f32 %v266_v4, %v260_v3  ;;  %v273_v9 = vrot.slane %v272_v5, 4  ;;  %v557_v10 = vpop.f32.mrb[3].mxu1 }
 0x1fe   :  { %v268_v11 = vrot.slane %v267_v8, 2  ;;  %v274_v12 = vadd.f32 %v273_v9, %v272_v5 }
 0x200   :  { %v269_v13 = vadd.f32 %v268_v11, %v267_v8  ;;  %v275_v14 = vrot.slane %v274_v12, 2 }
 0x202   :  { %v270_v15 = vrot.slane %v269_v13, 1  ;;  %v276_v16 = vadd.f32 %v275_v14, %v274_v12 }
 0x204   :  { %v271_v1 = vadd.f32 %v270_v15, %v269_v13  ;;  %v277_v17 = vrot.slane %v276_v16, 1 }
 0x206   :  { %v278_v18 = vadd.f32 %v277_v17, %v276_v16  ;;  %v279_v19 = vmul.f32 0.125, %v271_v1 }
 0x208   :  { %v280_v20 = vmul.f32 0.125, %v278_v18  ;;  %v281_v21 = vmul.f32 %v279_v19, %v279_v19 }
 0x20a   :  { %v282_v22 = vsub.f32 %v280_v20, %v281_v21 }
 0x20c   :  { %v283_v23 = vmax.f32 %v282_v22, 0.0 }
 0x20e   :  { %v284_v24 = vadd.f32 1e-05, %v283_v23 }
 0x210   :  { %607 = vrsqrt.f32 %v284_v24 }
 0x21a   :  { %v608_v25 = vpop.eup %607 }
 0x21b   :  { %v286_v26 = vmul.f32 %v608_v25, %v739_v44 }
 0x21d   :  { %v287_v28 = vmul.f32 %v286_v26, %v279_v19  ;;  %v295_v30 = vrot.slane %v286_v26, %v294_v27 }
 0x21f   :  { %v289_v29 = vrot.slane %v287_v28, 7  ;;  %v296_v33 = vmul.f32 %v295_v30, %v260_v3 }
 0x221   :  { %v291_v32 = vsub.f32 %v739_v44, %v289_v29 }
 0x223   :  { %v300_v34 = vrot.slane %v291_v32, %v299_v31 }
 0x225   :  { %v301_v35 = vadd.f32 %v300_v34, %v296_v33 }
 0x227   :  { %v302_v36 = vmax.f32 %v301_v35, 0.0 }
 0x229   :  { %v303_v37 = vpack.c.bf16 %v302_v36, %v302_v36 }
 0x22b   :  { %575 = vmatmul.mubr.bf16.vlgmr.msra.gmra.mrb[4].mxu0 %v303_v37 }
 0x2fe   :  { %v407_v40 = vpop.f32.mrb[4].mxu0 }
 0x2ff   :  { %v408_v41 = vadd.f32 %v407_v40, %v324_v39  ;;  %v576_v42 = vpop.f32.mrb[5].mxu0 }
 0x300   :  { %v410_v45 = vpop.f32.mrb[6].mxu0 }
 0x301   :  { %v490_v46 = vmul.f32 -1.442695, %v408_v41  ;;  %v577_v47 = vpop.f32.mrb[7].mxu0 }
 0x303   :  { %609 = vpow2.f32 %v490_v46 }
 0x30d   :  { %v610_v48 = vpop.eup %609 }
 0x30e   :  { %v416_v49 = vadd.f32 1.0, %v610_v48 }
 0x310   :  { %611 = vrcp.f32 %v416_v49 }
 0x31a   :  { %v612_v50 = vpop.eup %611 }
 0x31b   :  { %419 = vst [vmem:[#allocation2] sm:$0xff] %v612_v50 }
 0x31c   :  { %624 = shalt.err (!%p621_p4)
}
 0x31d   :  { %s625_s11 = scalar_lea.hbm %s797_s3, 128 }
 0x31e   :  { %p626_p5 = scmp.ne.s32.totalorder %s797_s3, %s625_s11  ;;  %p629_p6 = scmp.lt.u32.totalorder %s625_s11, %s797_s3 }
 0x320   :  { %p631_p7 = pnand %p629_p6, %p626_p5 }
 0x322   :  { %634 = shalt.err (!%p631_p7)
}
 0x323   :  { %429 = dma.vmem_to_hbm [thread:$0]  %s427_s7, 128, %s797_s3, [#allocation3]  }
 0x324   :  { %635 = dma.done.wait [#allocation3], 128  }
 0x325   :  { %636 = vsyncadd [#allocation3], 4294967168 }
 0x326   :  { %433 = vsyncpa [#allocation3], 1 }

</bundles_post_ra>
